<compile_context>
chip_gen: v7x
topology: tpu7x:2x2x1
jax: 0.10.0
libtpu: 0.0.40
codegen_flags: <defaults>
</compile_context>

<pallas_src>
import functools

import jax
import jax.numpy as jnp
from jax.experimental import pallas as pl
from jax.experimental.pallas import tpu as pltpu


def _round_up(a: int, b: int) -> int:
    return (a + b - 1) // b * b


def _corr2d_kernel(*refs, kh: int, kw: int):
    # refs (kh == 1): x_cur, weight, bias, out
    # refs (kh  > 1): x_cur, halo (hr rows), weight, bias, out
    if kh > 1:
        x_ref, halo_ref, w_ref, b_ref, o_ref = refs
    else:
        x_ref, w_ref, b_ref, o_ref = refs
        halo_ref = None

    tm = x_ref.shape[0]
    wp = x_ref.shape[1]
    wout = o_ref.shape[1]

    # Single load of the input tile; cast to f32 in-registers (input stays in
    # its original dtype in HBM).
    x_cur = x_ref[...].astype(jnp.float32)
    if kh > 1:
        # Splice the small row halo below the current tile once; the per-tap
        # shifted rows are then cheap static sublane slices.
        x_ext = jnp.concatenate([x_cur, halo_ref[...].astype(jnp.float32)],
                                axis=0)
    else:
        x_ext = x_cur

    acc = None
    # Static unroll over the (small) kernel taps.
    for di in range(kh):
        x_row = x_cur if di == 0 else x_ext[di:di + tm, :]
        for dj in range(kw):
            # Lane shift by -dj (wrap-around only touches columns >= Wout,
            # which are never stored).  Rolls go to the XLU slot.
            x_tap = x_row if dj == 0 else pltpu.roll(x_row, wp - dj, 1)
            term = w_ref[di, dj] * x_tap
            if acc is None:
                acc = term + b_ref[0]        # fold bias into the init
            else:
                acc = acc + term

    # Single fused store of exactly the valid output columns.
    o_ref[...] = acc[:, :wout].astype(o_ref.dtype)


def conv2d_forward(x, weight, bias, *, row_tile=None,
                   vmem_budget_bytes=32 * 1024 * 1024):
    """Pallas equivalent of Conv2D.forward: corr2d(x, weight) + bias."""
    H, W = x.shape
    kh, kw = weight.shape
    Hout, Wout = H - kh + 1, W - kw + 1
    assert Hout >= 1 and Wout >= 1, "kernel larger than input"

    # Lane-aligned input tile width (no jnp.pad pass: the BlockSpec simply
    # requests a wider partial boundary block).
    Wp = _round_up(max(W, kw), 128)
    # Minimal row halo (only needed when kh > 1): kh-1 rows rounded up to a
    # whole sublane group.
    hr = _round_up(kh - 1, 8) if kh > 1 else 0

    x_bytes = jnp.dtype(x.dtype).itemsize

    if row_tile is None:
        # ~12 live full-width tiles: 2x input + 2x halo + 2x output
        # double-buffered blocks plus ~6 in-kernel f32 temporaries.
        live_tiles = 12
        tm_cap = max(8, (vmem_budget_bytes // (live_tiles * Wp * 4)) // 8 * 8)
        # Prefer >= 2 row tiles so both v7x TensorCores get work.
        two_tile = _round_up(pl.cdiv(Hout, 2), 8) if Hout > 8 else 8
        row_tile = min(_round_up(Hout, 8), 1024, tm_cap, two_tile)
    tm = _round_up(int(row_tile), max(8, hr))
    assert tm % 8 == 0

    nb = pl.cdiv(Hout, tm)                   # output row tiles (grid)

    in_specs = [pl.BlockSpec((tm, Wp), lambda i: (i, 0))]   # current rows
    operands = [x]
    if kh > 1:
        bpt = tm // hr                       # halo row-blocks per row tile
        max_hb = (H - 1) // hr               # last halo block that overlaps x
        # Halo = the first hr rows below the current tile, clamped in-bounds.
        # When the clamp triggers, no valid output row needs halo data.
        in_specs.append(
            pl.BlockSpec((hr, Wp),
                         lambda i: (jnp.minimum((i + 1) * bpt, max_hb), 0)))
        operands.append(x)
    in_specs += [
        pl.BlockSpec(memory_space=pltpu.MemorySpace.SMEM),   # weight taps
        pl.BlockSpec(memory_space=pltpu.MemorySpace.SMEM),   # bias
    ]
    operands += [weight.astype(jnp.float32), bias.astype(jnp.float32)]

    # Explicit scoped-VMEM limit consistent with the tile sizing above.
    need = ((2 * tm + 2 * hr) * Wp * x_bytes          # double-buffered inputs
            + 2 * tm * Wout * 4                        # double-buffered output
            + 6 * (tm + hr) * Wp * 4)                  # in-kernel temporaries
    vmem_limit = int(min(max(vmem_budget_bytes, need + (1 << 20)),
                         64 * 1024 * 1024))

    cost = pl.CostEstimate(
        flops=2 * kh * kw * Hout * Wout,
        transcendentals=0,
        bytes_accessed=(x.size * x_bytes + nb * hr * Wp * x_bytes
                        + 4 * (Hout * Wout + kh * kw + 1)),
    )

    out = pl.pallas_call(
        functools.partial(_corr2d_kernel, kh=kh, kw=kw),
        out_shape=jax.ShapeDtypeStruct((Hout, Wout), jnp.float32),
        grid=(nb,),
        in_specs=in_specs,
        out_specs=pl.BlockSpec((tm, Wout), lambda i: (i, 0)),
        compiler_params=pltpu.CompilerParams(
            dimension_semantics=("parallel",),
            vmem_limit_bytes=vmem_limit),
        cost_estimate=cost,
    )(*operands)
    return out


def _corr2d_ref(x, k):
    """Pure-JAX reference mirroring the PyTorch corr2d double loop."""
    kh, kw = k.shape
    Hout, Wout = x.shape[0] - kh + 1, x.shape[1] - kw + 1
    out = jnp.zeros((Hout, Wout), jnp.float32)
    for di in range(kh):
        for dj in range(kw):
            out = out + k[di, dj] * x[di:di + Hout, dj:dj + Wout]
    return out


if __name__ == "__main__":
    key = jax.random.PRNGKey(0)
    k_w, k_x = jax.random.split(key)

    # Module spec: Conv2D(kernel_size=(1, 2)) applied to X = torch.rand(8, 8).
    kernel_size = (1, 2)
    weight = jax.random.uniform(k_w, kernel_size, dtype=jnp.float32)
    bias = jnp.zeros((1,), dtype=jnp.float32)
    x = jax.random.uniform(k_x, (8, 8), dtype=jnp.float32)

    out = jax.block_until_ready(conv2d_forward(x, weight, bias))
    ref = _corr2d_ref(x, weight) + bias[0]
    assert out.shape == (8, 7), out.shape
    assert jnp.allclose(out, ref, atol=1e-5, rtol=1e-5)

    # Second case: multi-tile grid (3 row tiles) with a 2x3 kernel, exercising
    # the kh > 1 small-row-halo splice, the clamped halo index_map on the last
    # tile, and a 256-wide lane-aligned input block with a masked output store.
    k_w2, k_x2 = jax.random.split(k_w)
    w2 = jax.random.uniform(k_w2, (2, 3), dtype=jnp.float32)
    b2 = jnp.array([0.25], dtype=jnp.float32)
    x2 = jax.random.uniform(k_x2, (24, 150), dtype=jnp.float32)
    out2 = jax.block_until_ready(conv2d_forward(x2, w2, b2, row_tile=8))
    ref2 = _corr2d_ref(x2, w2) + b2[0]
    assert out2.shape == (23, 148), out2.shape
    assert jnp.allclose(out2, ref2, atol=1e-5, rtol=1e-5)

    print("KERNEL_OK")
</pallas_src>

<mosaic_0001>
module attributes {stable_mosaic.version = 11 : i64} {
  func.func @_corr2d_kernel(%arg0: i32, %arg1: memref<8x128xf32, #tpu.memory_space<vmem>>, %arg2: memref<1x2xf32, #tpu.memory_space<smem>>, %arg3: memref<1xf32, #tpu.memory_space<smem>>, %arg4: memref<8x7xf32, #tpu.memory_space<vmem>>) attributes {dimension_semantics = [#tpu.dimension_semantics<parallel>], iteration_bounds = array<i64: 1>, scalar_prefetch = 0 : i64, scratch_operands = 0 : i64, tpu.core_type = #tpu.core_type<tc>, window_params = [{transform_indices = @transform_0, window_bounds = array<i64: 8, 128>}, {transform_indices = @transform_1, window_bounds = array<i64: 1, 2>}, {transform_indices = @transform_2, window_bounds = array<i64: 1>}, {transform_indices = @transform_3, window_bounds = array<i64: 8, 7>}]} {
    %c0 = arith.constant 0 : index
    %c0_0 = arith.constant 0 : index
    %0 = vector.load %arg1[%c0, %c0_0] : memref<8x128xf32, #tpu.memory_space<vmem>>, vector<8x128xf32>
    %c0_1 = arith.constant 0 : index
    %c0_2 = arith.constant 0 : index
    %1 = memref.load %arg2[%c0_1, %c0_2] : memref<1x2xf32, #tpu.memory_space<smem>>
    %2 = vector.broadcast %1 : f32 to vector<8x128xf32>
    %3 = arith.mulf %2, %0 : vector<8x128xf32>
    %c0_3 = arith.constant 0 : index
    %4 = memref.load %arg3[%c0_3] : memref<1xf32, #tpu.memory_space<smem>>
    %5 = vector.broadcast %4 : f32 to vector<8x128xf32>
    %6 = arith.addf %3, %5 : vector<8x128xf32>
    %c127_i32 = arith.constant 127 : i32
    %7 = tpu.dynamic_rotate %0 by %c127_i32 dim 1 : vector<8x128xf32>, i32 -> vector<8x128xf32>
    %c0_4 = arith.constant 0 : index
    %c1 = arith.constant 1 : index
    %8 = memref.load %arg2[%c0_4, %c1] : memref<1x2xf32, #tpu.memory_space<smem>>
    %9 = vector.broadcast %8 : f32 to vector<8x128xf32>
    %10 = arith.mulf %9, %7 : vector<8x128xf32>
    %11 = arith.addf %6, %10 : vector<8x128xf32>
    %12 = vector.extract_strided_slice %11 {offsets = [0, 0], sizes = [8, 7], strides = [1, 1]} : vector<8x128xf32> to vector<8x7xf32>
    %c0_5 = arith.constant 0 : index
    %c0_6 = arith.constant 0 : index
    %13 = vector.load %arg4[%c0_5, %c0_6] : memref<8x7xf32, #tpu.memory_space<vmem>>, vector<8x7xf32>
    tpu.vector_store %arg4[%c0_5, %c0_6], %12 {strides = array<i32>} : memref<8x7xf32, #tpu.memory_space<vmem>>, vector<8x7xf32>,
    return
  }
  func.func @transform_0(%arg0: i32) -> (i32, i32) {
    %c0_i32 = arith.constant 0 : i32
    %c0_i32_0 = arith.constant 0 : i32
    return %arg0, %c0_i32 : i32, i32
  }
  func.func @transform_1(%arg0: i32) -> (i32, i32) {
    %c0_i32 = arith.constant 0 : i32
    %c0_i32_0 = arith.constant 0 : i32
    %c0_i32_1 = arith.constant 0 : i32
    return %c0_i32, %c0_i32_0 : i32, i32
  }
  func.func @transform_2(%arg0: i32) -> i32 {
    %c0_i32 = arith.constant 0 : i32
    %c0_i32_0 = arith.constant 0 : i32
    return %c0_i32 : i32
  }
  func.func @transform_3(%arg0: i32) -> (i32, i32) {
    %c0_i32 = arith.constant 0 : i32
    %c0_i32_0 = arith.constant 0 : i32
    return %arg0, %c0_i32 : i32, i32
  }
}

</mosaic_0001>

<bundles_post_ra>
// kernel: tpu_custom_call.1
= control target key start
LH: loop header
LB: loop body
LE: loop exit
PB: predicated region body
PF: predicated region fallthrough
CT: control target
= control target key end

     0   :  { %9 = vsyncpa [#allocation4], 0  ;;  %s193_s0 = inlined_call_operand.hbm [shape: f32[8,8], index: 0, kind: input, shape index: {}]   ;;  %s194_s1 = inlined_call_operand.vmem [shape: f32[1,2], index: 1, kind: input, shape index: {}]   ;;  %s195_s2 = inlined_call_operand.<no memory space> [shape: f32[1], index: 2, kind: input, shape index: {}]   ;;  %s196_s3 = inlined_call_operand.hbm [shape: f32[8,7], index: 3, kind: output, shape index: {}]  }
   0x1   :  { %10 = vsyncpa [#allocation6], 0 }
   0x2   :  { %11 = vsyncpa [#allocation5], 0  ;;  %s28_s14 = sshll.u32 %s194_s1, 4  ;;  %s139_s15 = smov [#allocation3]   ;;  %s29_s14 = int_to_ptr.vmem [resolvable:$true] %s28_s14 }
   0x3   :  { %s18_s16 = sshll.u32 %s139_s15, 4  ;;  %s77_s19 = scalar_lea.hbm %s193_s0, 128  ;;  %s19_s16 = int_to_ptr.vmem [resolvable:$true] %s18_s16 }
   0x4   :  { %p78_p0 = scmp.ne.s32.totalorder %s193_s0, %s77_s19  ;;  %p81_p1 = scmp.lt.u32.totalorder %s77_s19, %s193_s0 }
   0x6   :  { %p83_p2 = pnand %p81_p1, %p78_p0 }
   0x8   :  { %86 = shalt.err (!%p83_p2)
}
   0x9   :  { %s87_s24 = scalar_lea.vmem %s19_s16, 128  ;;  %p92_p4 = scmp.lt.s32.totalorder %s19_s16, %s19_s16 }
   0xa   :  { %p88_p3 = scmp.ne.s32.totalorder %s19_s16, %s87_s24  ;;  %p93_p5 = scmp.lt.s32.totalorder %s87_s24, %s87_s24 }
   0xc   :  { %p94_p6 = por %p93_p5, %p92_p4 }
   0xe   :  { %p95_p7 = pnand %p94_p6, %p88_p3 }
  0x10   :  { %98 = shalt.err (!%p95_p7)
}
  0x11   :  { %21 = dma.hbm_to_vmem [thread:$0]  %s193_s0, 128, %s19_s16, [#allocation4]  }
  0x12   :  { %s99_s26 = scalar_lea.vmem %s29_s14, 16  ;;  %p104_p9 = scmp.lt.s32.totalorder %s29_s14, %s29_s14 }
  0x13   :  { %p100_p8 = scmp.ne.s32.totalorder %s29_s14, %s99_s26  ;;  %p105_p10 = scmp.lt.s32.totalorder %s99_s26, %s99_s26 }
  0x15   :  { %p106_p11 = por %p105_p10, %p104_p9 }
  0x17   :  { %p107_p12 = pnand %p106_p11, %p100_p8 }
  0x19   :  { %110 = shalt.err (!%p107_p12)
}
  0x1a   :  { %s140_s27 = smov [#allocation7]  }
  0x1b   :  { %31 = dma.vmem_to_smem %s29_s14, 16, %s140_s27, [#allocation6]  }
  0x1c   :  { %133 = dma.done.wait [#allocation4], 128  }
  0x1d   :  { %134 = vsyncadd [#allocation4], 4294967168 }
  0x1e   :  { %135 = dma.done.wait [#allocation6], 16  }
  0x1f   :  { %136 = vsyncadd [#allocation6], 4294967280 }
  0x20   :  { %40 = sfence }
  0x21   :  { %v41_v0 = vld [vmem:[#allocation3] sm:$0xff]  ;;  %s141_s28 = smov 127   ;;  %s42_s29 = sld [smem:[#allocation7]]  ;;  %v46_v3 = vstv %s195_s2  ;;  %vm54_vm0 = vcmask 56320  }
  0x22   :  { %48 = vrot.lane.b32.xlu0 %v41_v0, %s141_s28  ;;  %s72_s30 = sld [smem:[#allocation7 + $0x1]]  ;;  %s142_s5 = smov [#allocation8]  }
  0x23   :  { %s62_s6 = sshll.u32 %s142_s5, 4  ;;  %s63_s6 = int_to_ptr.vmem [resolvable:$true] %s62_s6 }
  0x24   :  { %s111_s7 = scalar_lea.vmem %s63_s6, 128  ;;  %p116_p0 = scmp.lt.s32.totalorder %s63_s6, %s63_s6 }
  0x25   :  { %p112_p13 = scmp.ne.s32.totalorder %s63_s6, %s111_s7  ;;  %p117_p1 = scmp.lt.s32.totalorder %s111_s7, %s111_s7 }
  0x27   :  { %v43_v1 = vstv %s42_s29  ;;  %p118_p2 = por %p117_p1, %p116_p0 }
  0x28   :  { %v44_v2 = vmul.f32 %v43_v1, %v41_v0  ;;  %v51_v4 = vstv %s72_s30 }
  0x29   :  { %p119_p3 = pnand %p118_p2, %p112_p13 }
  0x2a   :  { %v47_v5 = vadd.f32 %v46_v3, %v44_v2 }
  0x94   :  { %v49_v6 = vpop.permute.xlu0 %48 }
  0x95   :  { %v52_v7 = vmul.f32 %v51_v4, %v49_v6 }
  0x97   :  { %v53_v8 = vadd.f32 %v52_v7, %v47_v5 }
  0x99   :  { %55 = vst.msk [vmem:[#allocation8] sm:$0xff] %vm54_vm0, %v53_v8 }
  0x9a   :  { %122 = shalt.err (!%p119_p3)
}
  0x9b   :  { %s123_s2 = scalar_lea.hbm %s196_s3, 128 }
  0x9c   :  { %p124_p4 = scmp.ne.s32.totalorder %s196_s3, %s123_s2  ;;  %p127_p5 = scmp.lt.u32.totalorder %s123_s2, %s196_s3 }
  0x9e   :  { %p129_p6 = pnand %p127_p5, %p124_p4 }
  0xa0   :  { %132 = shalt.err (!%p129_p6)
}
  0xa1   :  { %65 = dma.vmem_to_hbm [thread:$0]  %s63_s6, 128, %s196_s3, [#allocation5]  }
  0xa2   :  { %137 = dma.done.wait [#allocation5], 128  }
  0xa3   :  { %138 = vsyncadd [#allocation5], 4294967168 }
  0xa4   :  { %69 = vsyncpa [#allocation4], 1 }
  0xa5   :  { %70 = vsyncpa [#allocation5], 1 }
  0xa6   :  { %71 = vsyncpa [#allocation6], 1 }

</bundles_post_ra>
